<compile_context>
chip_gen: v7x
topology: tpu7x:2x2x1
jax: 0.10.0
libtpu: 0.0.40
codegen_flags: <defaults>
</compile_context>

<pallas_src>
import functools

import jax
import jax.numpy as jnp
from jax import lax
from jax.experimental import pallas as pl
from jax.experimental.pallas import tpu as pltpu


def _vq_kernel(z_ref, e_ref, hesq_ref, zq_ref, idx_ref, sse_ref, *, bf16_scores):
    _, C, THW = z_ref.shape
    K, _D = e_ref.shape

    zb = z_ref[...].reshape(C, THW).astype(jnp.float32)     # (D, THW), D == C
    e = e_ref[...].astype(jnp.float32)                      # (K, D)
    half_esq = hesq_ref[...]                                 # (K, 1) = 0.5*|e|^2

    # score[k, t] = 0.5*|e_k|^2 - e_k . z_t ; argmin_k score == argmin_k |z_t - e_k|^2
    # (the per-row |z|^2 term is constant across k and is dropped).
    if bf16_scores:
        ze = lax.dot_general(e.astype(jnp.bfloat16), zb.astype(jnp.bfloat16),
                             (((1,), (0,)), ((), ())),
                             preferred_element_type=jnp.float32)     # (K, THW)
    else:
        ze = lax.dot_general(e, zb, (((1,), (0,)), ((), ())),
                             preferred_element_type=jnp.float32)     # (K, THW)
    score = half_esq - ze                                             # (K, THW)

    # argmin over K (first occurrence on ties), kept 2-D and lane-dense.
    min_score = jnp.min(score, axis=0, keepdims=True)                 # (1, THW)
    k_iota = lax.broadcasted_iota(jnp.int32, (K, THW), 0)             # (K, THW)
    cand = jnp.where(score <= min_score, k_iota, jnp.int32(K))
    idx = jnp.min(cand, axis=0, keepdims=True)                        # (1, THW) int32
    idx_ref[...] = idx[None]                                          # (1, 1, THW)

    # Gather the chosen codebook rows with a one-hot MXU matmul directly in
    # (D, THW) layout, so the z_q block is written back in NCHW order with no
    # transpose anywhere (in the kernel or the wrapper).
    onehot = (k_iota == idx).astype(jnp.float32)                      # (K, THW)
    zq = lax.dot_general(e, onehot, (((0,), (0,)), ((), ())),
                         preferred_element_type=jnp.float32)          # (D, THW)
    zq_ref[...] = zq[None].astype(zq_ref.dtype)

    # Per-tile partial SSE (exact over the full tile: no padding by construction).
    diff = zq - zb
    sq = diff * diff                                                  # (D, THW)
    partial = jnp.sum(jnp.sum(sq, axis=1, keepdims=True), axis=0, keepdims=True)
    sse_ref[...] = partial.reshape(1, 1, 1, 1)


@functools.partial(jax.jit, static_argnames=("beta", "bf16_scores"))
def vector_quantizer(z_nchw, embedding, *, beta=0.25, bf16_scores=False):
    """Forward pass of VectorQuantizer.

    Args:
      z_nchw:      (B, C, H, W) float, C == latent_dim.
      embedding:   (num_embeddings, latent_dim) float codebook.
      beta:        commitment loss weight.
      bf16_scores: cast the distance matmul to bf16 (v6e/v7x lever for large K;
                   argmin on near-ties may differ from the f32 reference).

    Returns:
      (z_q_nchw, min_encoding_indices, loss) matching the PyTorch module's
      forward values.
    """
    B, C, H, W = z_nchw.shape
    K, D = embedding.shape
    assert C == D, "channel dim must equal the codebook latent dim"
    HW = H * W

    # Free, contiguous reshape — no NCHW->NHWC transpose.
    z3 = z_nchw.reshape(B, C, HW)

    # Lane-dense HW tile: a multiple of 128 that divides HW, else the full HW
    # extent (full-dim blocks are always legal).  No padding, no tail mask.
    if HW % 128 == 0:
        THW = min(2048, HW)
        while HW % THW:
            THW //= 2
    else:
        THW = HW
    num_hw = HW // THW

    e_f32 = embedding.astype(jnp.float32)
    half_esq = 0.5 * jnp.sum(e_f32 * e_f32, axis=1, keepdims=True)    # (K, 1)

    # Per-step VMEM live-set estimate: double-buffered z/zq tiles, codebook +
    # 0.5|e|^2, (K, THW) score/one-hot/iota intermediates, (C, THW) diff.
    est = 4 * (4 * C * THW + 2 * (K * D + K) + 6 * K * THW + 2 * C * THW)
    vmem_limit = int(min(max(2 * est, 16 * 1024 * 1024), 48 * 1024 * 1024))

    kernel = functools.partial(_vq_kernel, bf16_scores=bf16_scores)

    zq3, idx3, sse_tiles = pl.pallas_call(
        kernel,
        out_shape=(
            jax.ShapeDtypeStruct((B, C, HW), z_nchw.dtype),
            jax.ShapeDtypeStruct((B, 1, HW), jnp.int32),
            jax.ShapeDtypeStruct((B, num_hw, 1, 1), jnp.float32),
        ),
        grid_spec=pltpu.PrefetchScalarGridSpec(
            num_scalar_prefetch=0,
            grid=(B, num_hw),
            in_specs=[
                pl.BlockSpec((1, C, THW), lambda b, j: (b, 0, j)),      # z (NCHW slab)
                pl.BlockSpec((K, D), lambda b, j: (0, 0)),              # codebook
                pl.BlockSpec((K, 1), lambda b, j: (0, 0)),              # 0.5*|e|^2
            ],
            out_specs=[
                pl.BlockSpec((1, C, THW), lambda b, j: (b, 0, j)),      # z_q (NCHW slab)
                pl.BlockSpec((1, 1, THW), lambda b, j: (b, 0, j)),      # lane-dense idx
                pl.BlockSpec((1, 1, 1, 1), lambda b, j: (b, j, 0, 0)),  # SSE partial
            ],
        ),
        compiler_params=pltpu.CompilerParams(
            dimension_semantics=("parallel", "parallel"),
            vmem_limit_bytes=vmem_limit),
    )(z3, e_f32, half_esq)

    sse = jnp.sum(sse_tiles)
    # mean((zq.detach()-z)^2) + beta*mean((zq-z.detach())^2): same forward value.
    loss = (1.0 + beta) * sse / jnp.float32(B * HW * C)

    idx = idx3.reshape(B * HW)          # (b, h, w) row-major == PyTorch flat order
    zq_nchw = zq3.reshape(B, C, H, W)   # straight-through forward value == z_q
    return zq_nchw, idx, loss


def _reference(z_nchw, embedding, beta):
    """Pure-JAX reference mirroring the PyTorch module."""
    B, C, H, W = z_nchw.shape
    z = jnp.transpose(z_nchw, (0, 2, 3, 1))
    z_flat = z.reshape(-1, C)
    dis = (jnp.sum(z_flat ** 2, axis=1, keepdims=True)
           + jnp.sum(embedding ** 2, axis=1)
           - 2.0 * z_flat @ embedding.T)
    idx = jnp.argmin(dis, axis=1)
    zq = embedding[idx].reshape(z.shape)
    loss = jnp.mean((zq - z) ** 2) + beta * jnp.mean((zq - z) ** 2)
    zq = jnp.transpose(zq, (0, 3, 1, 2))
    return zq, idx, loss, dis


if __name__ == "__main__":
    # Module config (small, consistent with the forward pass).
    num_embeddings = 128
    latent_dim = 32
    beta = 0.25

    key = jax.random.PRNGKey(0)
    k_emb, k_z = jax.random.split(key)

    # nn.Embedding weight init: uniform(-1/K, 1/K), shape (K, D).
    embedding = jax.random.uniform(
        k_emb, (num_embeddings, latent_dim), jnp.float32,
        minval=-1.0 / num_embeddings, maxval=1.0 / num_embeddings)

    # Input z in NCHW: (B, latent_dim, H, W).
    B, H, W = 2, 8, 8
    z = jax.random.normal(k_z, (B, latent_dim, H, W), jnp.float32)

    zq, idx, loss = vector_quantizer(z, embedding, beta=beta)
    jax.block_until_ready((zq, idx, loss))

    zq_ref, idx_ref, loss_ref, dis_ref = _reference(z, embedding, beta)

    assert zq.shape == (B, latent_dim, H, W)
    assert idx.shape == (B * H * W,)
    assert idx.dtype == jnp.int32

    # The kernel's index must be a valid nearest-code choice: equal to the
    # reference argmin, or (on f32 near-ties, since |z|^2 is dropped from the
    # score) within a tiny distance gap of the reference minimum.
    rows = jnp.arange(idx.shape[0])
    gap = jnp.abs(dis_ref[rows, idx] - dis_ref[rows, idx_ref])
    assert bool(jnp.all((idx == idx_ref) | (gap < 1e-3)))

    # z_q must be exactly the gathered codebook rows for the chosen indices.
    zq_gather = embedding[idx].reshape(B, H, W, latent_dim).transpose(0, 3, 1, 2)
    assert jnp.allclose(zq, zq_gather, atol=1e-6, rtol=1e-6)

    assert jnp.allclose(loss, loss_ref, atol=1e-5, rtol=1e-5)

    print("KERNEL_OK")
</pallas_src>

<mosaic_0001>
module attributes {stable_mosaic.version = 11 : i64} {
  func.func @_vq_kernel(%arg0: i32, %arg1: i32, %arg2: memref<1x32x64xf32, #tpu.memory_space<vmem>>, %arg3: memref<128x32xf32, #tpu.memory_space<vmem>>, %arg4: memref<128x1xf32, #tpu.memory_space<vmem>>, %arg5: memref<1x32x64xf32, #tpu.memory_space<vmem>>, %arg6: memref<1x1x64xi32, #tpu.memory_space<vmem>>, %arg7: memref<1x1x1x1xf32, #tpu.memory_space<vmem>>) attributes {dimension_semantics = [#tpu.dimension_semantics<parallel>, #tpu.dimension_semantics<parallel>], iteration_bounds = array<i64: 2, 1>, scalar_prefetch = 0 : i64, scratch_operands = 0 : i64, tpu.core_type = #tpu.core_type<tc>, window_params = [{transform_indices = @transform_0, window_bounds = array<i64: 1, 32, 64>}, {pipeline_mode = #tpu.pipeline_mode<synchronous>, transform_indices = @transform_1, window_bounds = array<i64: 128, 32>}, {pipeline_mode = #tpu.pipeline_mode<synchronous>, transform_indices = @transform_2, window_bounds = array<i64: 128, 1>}, {transform_indices = @transform_3, window_bounds = array<i64: 1, 32, 64>}, {transform_indices = @transform_4, window_bounds = array<i64: 1, 1, 64>}, {transform_indices = @transform_5, window_bounds = array<i64: 1, 1, 1, 1>}]} {
    %c0 = arith.constant 0 : index
    %c0_0 = arith.constant 0 : index
    %c0_1 = arith.constant 0 : index
    %0 = vector.load %arg2[%c0, %c0_0, %c0_1] : memref<1x32x64xf32, #tpu.memory_space<vmem>>, vector<1x32x64xf32>
    %1 = vector.shape_cast %0 : vector<1x32x64xf32> to vector<32x64xf32>
    %c0_2 = arith.constant 0 : index
    %c0_3 = arith.constant 0 : index
    %2 = vector.load %arg3[%c0_2, %c0_3] : memref<128x32xf32, #tpu.memory_space<vmem>>, vector<128x32xf32>
    %c0_4 = arith.constant 0 : index
    %c0_5 = arith.constant 0 : index
    %3 = vector.load %arg4[%c0_4, %c0_5] : memref<128x1xf32, #tpu.memory_space<vmem>>, vector<128x1xf32>
    %cst = arith.constant dense<0.000000e+00> : vector<128x64xf32>
    %4 = tpu.matmul %2, %1, %cst {dimension_numbers = #tpu.dot_dimension_numbers<[1], [0], [0], [1], [0, 0, 1, 1], [], []>} : vector<128x32xf32>, vector<32x64xf32>, vector<128x64xf32> -> vector<128x64xf32>
    %5 = vector.broadcast %3 : vector<128x1xf32> to vector<128x64xf32>
    %6 = arith.subf %5, %4 : vector<128x64xf32>
    %cst_6 = arith.constant dense<0x7F800000> : vector<64xf32>
    %7 = vector.multi_reduction <minimumf>, %6, %cst_6 [0] : vector<128x64xf32> to vector<64xf32>
    %8 = vector.shape_cast %7 : vector<64xf32> to vector<1x64xf32>
    %9 = tpu.iota {dimensions = array<i32: 0>} : vector<128x64xi32>
    %10 = vector.broadcast %8 : vector<1x64xf32> to vector<128x64xf32>
    %11 = arith.cmpf ole, %6, %10 : vector<128x64xf32>
    %c128_i32 = arith.constant 128 : i32
    %12 = vector.broadcast %c128_i32 : i32 to vector<128x64xi32>
    %13 = arith.select %11, %9, %12 : vector<128x64xi1>, vector<128x64xi32>
    %cst_7 = arith.constant dense<2147483647> : vector<64xi32>
    %14 = vector.multi_reduction <minsi>, %13, %cst_7 [0] : vector<128x64xi32> to vector<64xi32>
    %15 = vector.shape_cast %14 : vector<64xi32> to vector<1x64xi32>
    %16 = vector.shape_cast %15 : vector<1x64xi32> to vector<1x1x64xi32>
    %c0_8 = arith.constant 0 : index
    %c0_9 = arith.constant 0 : index
    %c0_10 = arith.constant 0 : index
    %17 = vector.load %arg6[%c0_8, %c0_9, %c0_10] : memref<1x1x64xi32, #tpu.memory_space<vmem>>, vector<1x1x64xi32>
    tpu.vector_store %arg6[%c0_8, %c0_9, %c0_10], %16 {strides = array<i32>} : memref<1x1x64xi32, #tpu.memory_space<vmem>>, vector<1x1x64xi32>,
    %18 = vector.broadcast %15 : vector<1x64xi32> to vector<128x64xi32>
    %19 = arith.cmpi eq, %9, %18 : vector<128x64xi32>
    %20 = arith.extui %19 : vector<128x64xi1> to vector<128x64xi32>
    %21 = arith.sitofp %20 : vector<128x64xi32> to vector<128x64xf32>
    %cst_11 = arith.constant dense<0.000000e+00> : vector<32x64xf32>
    %22 = tpu.matmul %2, %21, %cst_11 {dimension_numbers = #tpu.dot_dimension_numbers<[0], [0], [1], [1], [0, 1, 1, 1], [], []>} : vector<128x32xf32>, vector<128x64xf32>, vector<32x64xf32> -> vector<32x64xf32>
    %23 = vector.shape_cast %22 : vector<32x64xf32> to vector<1x32x64xf32>
    %c0_12 = arith.constant 0 : index
    %c0_13 = arith.constant 0 : index
    %c0_14 = arith.constant 0 : index
    %24 = vector.load %arg5[%c0_12, %c0_13, %c0_14] : memref<1x32x64xf32, #tpu.memory_space<vmem>>, vector<1x32x64xf32>
    tpu.vector_store %arg5[%c0_12, %c0_13, %c0_14], %23 {strides = array<i32>} : memref<1x32x64xf32, #tpu.memory_space<vmem>>, vector<1x32x64xf32>,
    %25 = arith.subf %22, %1 : vector<32x64xf32>
    %26 = arith.mulf %25, %25 : vector<32x64xf32>
    %cst_15 = arith.constant dense<0.000000e+00> : vector<32xf32>
    %27 = vector.multi_reduction <add>, %26, %cst_15 [1] : vector<32x64xf32> to vector<32xf32>
    %28 = vector.shape_cast %27 : vector<32xf32> to vector<32x1xf32>
    %cst_16 = arith.constant dense<0.000000e+00> : vector<1xf32>
    %29 = vector.multi_reduction <add>, %28, %cst_16 [0] : vector<32x1xf32> to vector<1xf32>
    %30 = vector.shape_cast %29 : vector<1xf32> to vector<1x1xf32>
    %31 = vector.shape_cast %30 : vector<1x1xf32> to vector<1x1x1x1xf32>
    %c0_17 = arith.constant 0 : index
    %c0_18 = arith.constant 0 : index
    %c0_19 = arith.constant 0 : index
    %c0_20 = arith.constant 0 : index
    %32 = vector.load %arg7[%c0_17, %c0_18, %c0_19, %c0_20] : memref<1x1x1x1xf32, #tpu.memory_space<vmem>>, vector<1x1x1x1xf32>
    tpu.vector_store %arg7[%c0_17, %c0_18, %c0_19, %c0_20], %31 {strides = array<i32>} : memref<1x1x1x1xf32, #tpu.memory_space<vmem>>, vector<1x1x1x1xf32>,
    return
  }
  func.func @transform_0(%arg0: i32, %arg1: i32) -> (i32, i32, i32) {
    %c0_i32 = arith.constant 0 : i32
    %c0_i32_0 = arith.constant 0 : i32
    return %arg0, %c0_i32, %arg1 : i32, i32, i32
  }
  func.func @transform_1(%arg0: i32, %arg1: i32) -> (i32, i32) {
    %c0_i32 = arith.constant 0 : i32
    %c0_i32_0 = arith.constant 0 : i32
    %c0_i32_1 = arith.constant 0 : i32
    return %c0_i32, %c0_i32_0 : i32, i32
  }
  func.func @transform_2(%arg0: i32, %arg1: i32) -> (i32, i32) {
    %c0_i32 = arith.constant 0 : i32
    %c0_i32_0 = arith.constant 0 : i32
    %c0_i32_1 = arith.constant 0 : i32
    return %c0_i32, %c0_i32_0 : i32, i32
  }
  func.func @transform_3(%arg0: i32, %arg1: i32) -> (i32, i32, i32) {
    %c0_i32 = arith.constant 0 : i32
    %c0_i32_0 = arith.constant 0 : i32
    return %arg0, %c0_i32, %arg1 : i32, i32, i32
  }
  func.func @transform_4(%arg0: i32, %arg1: i32) -> (i32, i32, i32) {
    %c0_i32 = arith.constant 0 : i32
    %c0_i32_0 = arith.constant 0 : i32
    return %arg0, %c0_i32, %arg1 : i32, i32, i32
  }
  func.func @transform_5(%arg0: i32, %arg1: i32) -> (i32, i32, i32, i32) {
    %c0_i32 = arith.constant 0 : i32
    %c0_i32_0 = arith.constant 0 : i32
    %c0_i32_1 = arith.constant 0 : i32
    return %arg0, %arg1, %c0_i32, %c0_i32_0 : i32, i32, i32, i32
  }
}

</mosaic_0001>

<bundles_post_ra>
// kernel: vector_quantizer.1
= control target key start
LH: loop header
LB: loop body
LE: loop exit
PB: predicated region body
PF: predicated region fallthrough
CT: control target
= control target key end

     0   :  { %s1407_s18 = smov 0   ;;  %s1409_s19 = smov 0   ;;  %s1785_s0 = inlined_call_operand.vmem [shape: f32[2,32,64], index: 0, kind: input, shape index: {}]   ;;  %s1786_s1 = inlined_call_operand.vmem [shape: f32[128,32], index: 1, kind: input, shape index: {}]   ;;  %s1787_s2 = inlined_call_operand.vmem [shape: f32[128,1], index: 2, kind: input, shape index: {}]   ;;  %s1788_s3 = inlined_call_operand.vmem [shape: f32[2,32,64], index: 3, kind: output, shape index: {0}]   ;;  %s1789_s4 = inlined_call_operand.vmem [shape: s32[2,1,64], index: 4, kind: output, shape index: {1}]   ;;  %s1790_s5 = inlined_call_operand.vmem [shape: f32[2,1,1,1], index: 5, kind: output, shape index: {2}]  }
   0x1   :  { %s1411_s20 = smov 0  }
   0x2 LB: > { %s28_s21 = sadd.s32 1, %s1369_s19  ;;  %p1116_p0 = scmp.ge.s32.totalorder %s1373_s20, 1  ;;  %s1373_s20 = sphi %s1411_s20, %s16_s20   ;;  %s1369_s19 = sphi %s1409_s19, %s1792_s19   ;;  %s1365_s18 = sphi %s1407_s18, %s1791_s18  }
   0x3   : > { %p30_p1 = scmp.ge.s32.totalorder %s28_s21, 2  ;;  %p215_p2 = scmp.lt.s32.totalorder %s1373_s20, 3 }
   0x5   : > { %s1794_s21 = smov (%p30_p1, %s28_s21), 0  ;;  %p216_p3 = pnand %p1116_p0, %p215_p2 }
   0x6   : > { %p261_p4 = scmp.lt.s32.totalorder (!%p216_p3), %s1365_s18, 1  ;;  %v1428_v0 = vld [vmem:[%s1786_s1] sm:$0xff] (!%p216_p3)  ;;  %vm325_vm0 = vcmask (!%p216_p3), 261120   ;;  %v1375_v1 = vmov (!%p216_p3), 0   ;;  %v311_v2 = vld [vmem:[%s1787_s2 + $0x10] sm:$0xff] (!%p216_p3)  ;;  %v312_v9 = vld [vmem:[%s1787_s2 + $0x18] sm:$0xff] (!%p216_p3) }
   0x7   : > { %219 = sbr.rel (%p216_p3) target bundleno = 746 (0x2ea), region = 32  ;;  %1221 = vmatprep.mubr.msk.f32.mxu0 (!%p216_p3), %vm325_vm0, %v1428_v0  ;;  %1350 = vset.pattern.permute.xlu1 (!%p216_p3), %v1375_v1  ;;  %v309_v3 = vld [vmem:[%s1787_s2] sm:$0xff] (!%p216_p3)  ;;  %v310_v11 = vld [vmem:[%s1787_s2 + $0x8] sm:$0xff] (!%p216_p3)  ;;  %v295_v15 = vld [vmem:[%s1786_s1 + $0x10] sm:$0xff] (!%p216_p3)  ;;  %vm615_vm1 = vcmask (!%p216_p3), 523264  }
   0x8   : > { %1349 = vset.pattern.permute.xlu0 (!%p216_p3), %v1375_v1  ;;  %531 = vperm.xlu1 (!%p216_p3), %1350, %v311_v2   ;;  %v314_v12 = vld [vmem:[%s1787_s2 + $0x28] sm:$0xff] (!%p216_p3)  ;;  %v313_v13 = vld [vmem:[%s1787_s2 + $0x20] sm:$0xff] (!%p216_p3)  ;;  %v316_v16 = vld [vmem:[%s1787_s2 + $0x38] sm:$0xff] (!%p216_p3) }
   0x9   : > { %521 = vperm.xlu0 (!%p216_p3), %1349, %v309_v3   ;;  %v294_v14 = vld [vmem:[%s1786_s1 + $0x8] sm:$0xff] (!%p216_p3)  ;;  %v315_v17 = vld [vmem:[%s1787_s2 + $0x30] sm:$0xff] (!%p216_p3)  ;;  %v296_v18 = vld [vmem:[%s1786_s1 + $0x18] sm:$0xff] (!%p216_p3) }
   0xa   : > { %v297_v19 = vld [vmem:[%s1786_s1 + $0x20] sm:$0xff] (!%p216_p3)  ;;  %v318_v20 = vld [vmem:[%s1787_s2 + $0x48] sm:$0xff] (!%p216_p3)  ;;  %v299_v23 = vld [vmem:[%s1786_s1 + $0x30] sm:$0xff] (!%p216_p3) }
   0xb   : > { %v317_v21 = vld [vmem:[%s1787_s2 + $0x40] sm:$0xff] (!%p216_p3)  ;;  %v298_v22 = vld [vmem:[%s1786_s1 + $0x28] sm:$0xff] (!%p216_p3)  ;;  %v320_v24 = vld [vmem:[%s1787_s2 + $0x58] sm:$0xff] (!%p216_p3) }
   0xc   : > { %536 = vperm.xlu1 (!%p216_p3), %1350, %v312_v9   ;;  %v319_v25 = vld [vmem:[%s1787_s2 + $0x50] sm:$0xff] (!%p216_p3)  ;;  %v300_v26 = vld [vmem:[%s1786_s1 + $0x38] sm:$0xff] (!%p216_p3)  ;;  %v301_v27 = vld [vmem:[%s1786_s1 + $0x40] sm:$0xff] (!%p216_p3) }
   0xd   : > { %526 = vperm.xlu0 (!%p216_p3), %1349, %v310_v11   ;;  %v322_v28 = vld [vmem:[%s1787_s2 + $0x68] sm:$0xff] (!%p216_p3)  ;;  %v321_v29 = vld [vmem:[%s1787_s2 + $0x60] sm:$0xff] (!%p216_p3)  ;;  %v303_v31 = vld [vmem:[%s1786_s1 + $0x50] sm:$0xff] (!%p216_p3) }
   0xe   : > { %s1796_s18 = smov (!%p261_p4, %s1365_s18), 1  ;;  %v302_v30 = vld [vmem:[%s1786_s1 + $0x48] sm:$0xff]  ;;  %v324_v32 = vld [vmem:[%s1787_s2 + $0x78] sm:$0xff]  ;;  %v323_v33 = vld [vmem:[%s1787_s2 + $0x70] sm:$0xff] }
   0xf   : > { %s1171_s24 = sshll.u32 %s1796_s18, 5  ;;  %v304_v34 = vld [vmem:[%s1786_s1 + $0x58] sm:$0xff]  ;;  %v305_v35 = vld [vmem:[%s1786_s1 + $0x60] sm:$0xff]  ;;  %v306_v36 = vld [vmem:[%s1786_s1 + $0x68] sm:$0xff]  ;;  %s282_s7 = scalar_lea.vmem %s1789_s4, %s1796_s18 }
  0x10   : > { %s268_s27 = scalar_lea.vmem %s1785_s0, %s1171_s24  ;;  %546 = vperm.xlu1 %1350, %v314_v12   ;;  %v307_v37 = vld [vmem:[%s1786_s1 + $0x70] sm:$0xff]  ;;  %v308_v38 = vld [vmem:[%s1786_s1 + $0x78] sm:$0xff]  ;;  %s276_s10 = scalar_lea.vmem %s1788_s3, %s1171_s24 }
  0x11   : > { %v1446_v4 = vld [vmem:[%s268_s27] sm:$0xff]  ;;  %v1448_v5 = vld [vmem:[%s268_s27 + $0x8] sm:$0xff]  ;;  %v1450_v6 = vld [vmem:[%s268_s27 + $0x10] sm:$0xff]  ;;  %541 = vperm.xlu0 %1349, %v313_v13   ;;  %s288_s12 = scalar_lea.vmem %s1790_s5, %s1796_s18 }
  0x12   : > { %v1283_v7 = vpack.c.bf16 %v1448_v5, %v1446_v4  ;;  %v1454_v8 = vld [vmem:[%s268_s27 + $0x18] sm:$0xff] }
  0x13   : > { %v1287_v10 = vpack.c.bf16 %v1454_v8, %v1450_v6 }
  0x14   : > { %1284 = vmatprep.subr.bf16.mxu0 %v1283_v7  ;;  %556 = vperm.xlu1 %1350, %v316_v16  }
  0x15   : > { %1286 = vmatpush3.bf16.msra.mxu0 %v1283_v7  ;;  %551 = vperm.xlu0 %1349, %v315_v17  }
  0x16   : > { %1288 = vmatprep.subr.bf16.mxu0 %v1287_v10 }
  0x18   : > { %566 = vperm.xlu1 %1350, %v318_v20  }
  0x19   : > { %1290 = vmatpush3.bf16.msra.mxu0 %v1287_v10  ;;  %561 = vperm.xlu0 %1349, %v317_v21  }
  0x1c   : > { %1222 = vmatmul.mubr.msk.f32.vlgmr.msra.gmra.mrb[0].mxu0 %vm325_vm0, %v294_v14  ;;  %576 = vperm.xlu1 %1350, %v320_v24  }
  0x1d   : > { %1224 = vmatprep.mubr.msk.f32.mxu0 %vm325_vm0, %v295_v15  ;;  %571 = vperm.xlu0 %1349, %v319_v25  }
  0x20   : > { %1225 = vmatmul.mubr.msk.f32.gmra.mrb[2].mxu0 %vm325_vm0, %v296_v18  ;;  %586 = vperm.xlu1 %1350, %v322_v28  }
  0x21   : > { %1227 = vmatprep.mubr.msk.f32.mxu0 %vm325_vm0, %v297_v19  ;;  %581 = vperm.xlu0 %1349, %v321_v29  }
  0x24   : > { %1228 = vmatmul.mubr.msk.f32.gmra.mrb[4].mxu0 %vm325_vm0, %v298_v22  ;;  %596 = vperm.xlu1 %1350, %v324_v32  }
  0x25   : > { %1230 = vmatprep.mubr.msk.f32.mxu0 %vm325_vm0, %v299_v23  ;;  %591 = vperm.xlu0 %1349, %v323_v33  }
  0x28   : > { %1231 = vmatmul.mubr.msk.f32.gmra.mrb[6].mxu0 %vm325_vm0, %v300_v26 }
  0x29   : > { %1233 = vmatprep.mubr.msk.f32.mxu0 %vm325_vm0, %v301_v27 }
  0x2c   : > { %1234 = vmatmul.mubr.msk.f32.gmra.mrb[8].mxu0 %vm325_vm0, %v302_v30 }
  0x2d   : > { %1236 = vmatprep.mubr.msk.f32.mxu0 %vm325_vm0, %v303_v31 }
  0x30   : > { %1237 = vmatmul.mubr.msk.f32.gmra.mrb[10].mxu0 %vm325_vm0, %v304_v34 }
  0x31   : > { %1239 = vmatprep.mubr.msk.f32.mxu0 %vm325_vm0, %v305_v35 }
  0x34   : > { %1240 = vmatmul.mubr.msk.f32.gmra.mrb[12].mxu0 %vm325_vm0, %v306_v36 }
  0x35   : > { %1242 = vmatprep.mubr.msk.f32.mxu0 %vm325_vm0, %v307_v37 }
  0x38   : > { %1243 = vmatmul.mubr.msk.f32.gmra.mrb[14].mxu0 %vm325_vm0, %v308_v38 }
  0x43   : > { %807 = vxpose.xlu0.b32.start [1/16] (narrow) %v1428_v0, 32 }
  0x47   : > { %808 = vxpose.xlu0.b32.cont [2/16] (narrow) %v294_v14, 32 }
  0x4b   : > { %809 = vxpose.xlu0.b32.cont [3/16] (narrow) %v295_v15, 32 }
  0x4f   : > { %810 = vxpose.xlu0.b32.cont [4/16] (narrow) %v296_v18, 32 }
  0x53   : > { %811 = vxpose.xlu0.b32.cont [5/16] (narrow) %v297_v19, 32 }
  0x57   : > { %812 = vxpose.xlu0.b32.cont [6/16] (narrow) %v298_v22, 32 }
  0x5b   : > { %813 = vxpose.xlu0.b32.cont [7/16] (narrow) %v299_v23, 32 }
  0x5f   : > { %814 = vxpose.xlu0.b32.cont [8/16] (narrow) %v300_v26, 32 }
  0x63   : > { %815 = vxpose.xlu0.b32.cont [9/16] (narrow) %v301_v27, 32 }
  0x67   : > { %816 = vxpose.xlu0.b32.cont [10/16] (narrow) %v302_v30, 32 }
  0x6b   : > { %817 = vxpose.xlu0.b32.cont [11/16] (narrow) %v303_v31, 32 }
  0x6f   : > { %818 = vxpose.xlu0.b32.cont [12/16] (narrow) %v304_v34, 32 }
  0x73   : > { %819 = vxpose.xlu0.b32.cont [13/16] (narrow) %v305_v35, 32 }
  0x77   : > { %820 = vxpose.xlu0.b32.cont [14/16] (narrow) %v306_v36, 32 }
  0x7b   : > { %821 = vxpose.xlu0.b32.cont [15/16] (narrow) %v307_v37, 32 }
  0x7f   : > { %822 = vxpose.xlu0.b32.end [16/16] (narrow) %v308_v38, 32 }
  0x87   : > { %v532_v48 = vpop.permute.xlu1 %531 }
  0x88   : > { %v522_v39 = vpop.permute.xlu0 %521 }
  0x8b   : > { %v537_v49 = vpop.permute.xlu1 %536 }
  0x8c   : > { %v527_v40 = vpop.permute.xlu0 %526 }
  0x8f   : > { %v547_v50 = vpop.permute.xlu1 %546 }
  0x90   : > { %v542_v41 = vpop.permute.xlu0 %541 }
  0x93   : > { %v557_v53 = vpop.permute.xlu1 %556 }
  0x94   : > { %v552_v42 = vpop.permute.xlu0 %551 }
  0x97   : > { %v567_v61 = vpop.permute.xlu1 %566 }
  0x98   : > { %v562_v43 = vpop.permute.xlu0 %561 }
  0x9b   : > { %v577_v17 = vpop.permute.xlu1 %576 }
  0x9c   : > { %v572_v44 = vpop.permute.xlu0 %571 }
  0x9f   : > { %v587_v33 = vpop.permute.xlu1 %586 }
  0xa0   : > { %v582_v45 = vpop.permute.xlu0 %581 }
  0xa4   : > { %v1561_v46 = vpop.permute.xlu0 %591 }
  0xc3   : > { %v823_v47 = vpop.trf.xlu0 }
  0xc4   : > { %1277 = vmatprep.mubr.f32.mxu1 %v823_v47  ;;  %v597_v47 = vpop.permute.xlu1 %596 }
  0xef   : > { %v1223_v51 = vpop.f32.mrb[0].mxu0 }
  0xf0   : > { %v440_v52 = vpop.f32.mrb[1].mxu0  ;;  %v1563_v56 = vsub.f32 %v527_v40, %v1223_v51 }
  0xf1   : > { %v1565_v57 = vsub.f32 %v522_v39, %v440_v52 }
  0xf2   : > { %v617_v63 = vsel %vm615_vm1, %v1563_v56, inf }
  0xf3   : > { %v1226_v54 = vpop.f32.mrb[2].mxu0  ;;  %v616_v2 = vsel %vm615_vm1, %v1565_v57, inf }
  0xf4   : > { %v450_v55 = vpop.f32.mrb[3].mxu0  ;;  %v1573_v0 = vsub.f32 %v537_v49, %v1226_v54 }
  0xf5   : > { %v1579_v3 = vsub.f32 %v532_v48, %v450_v55 }
  0xf6   : > { %v619_v15 = vsel %vm615_vm1, %v1573_v0, inf }
  0xf7   : > { %v1229_v58 = vpop.f32.mrb[4].mxu0  ;;  %v618_v18 = vsel %vm615_vm1, %v1579_v3, inf }
  0xf8   : > { %v1567_v59 = vsub.f32 %v547_v50, %v1229_v58  ;;  %v460_v60 = vpop.f32.mrb[5].mxu0 }
  0xf9   : > { %v1569_v62 = vsub.f32 %v542_v41, %v460_v60 }
  0xfa   : > { %v622_v1 = vsel %vm615_vm1, %v1567_v59, inf }
  0xfb   : > { %v623_v7 = vmin.f32 %v617_v63, %v622_v1  ;;  %v620_v9 = vsel %vm615_vm1, %v1569_v62, inf  ;;  %v1232_v10 = vpop.f32.mrb[6].mxu0  ;;  %v653_v1 = vlaneseq }
  0xfc   : > { %v621_v11 = vmin.f32 %v616_v2, %v620_v9  ;;  %v1583_v12 = vsub.f32 %v557_v53, %v1232_v10  ;;  %v470_v13 = vpop.f32.mrb[7].mxu0 }
  0xfd   : > { %v1585_v14 = vsub.f32 %v552_v42, %v470_v13  ;;  %v1619_v9 = vshrl.u32 %v653_v1, 7 }
  0xfe   : > { %v626_v16 = vsel %vm615_vm1, %v1583_v12, inf }
  0xff   : > { %v627_v19 = vmin.f32 %v619_v15, %v626_v16  ;;  %v624_v20 = vsel %vm615_vm1, %v1585_v14, inf  ;;  %v1235_v21 = vpop.f32.mrb[8].mxu0  ;;  %v1622_v13 = vadd.s32 16, %v1619_v9  ;;  %v1625_v15 = vadd.s32 24, %v1619_v9 }
 0x100   : > { %v625_v22 = vmin.f32 %v618_v18, %v624_v20  ;;  %v1595_v23 = vsub.f32 %v567_v61, %v1235_v21  ;;  %v480_v24 = vpop.f32.mrb[9].mxu0  ;;  %v1628_v16 = vadd.s32 48, %v1619_v9  ;;  %v1634_v18 = vadd.s32 80, %v1619_v9 }
 0x101   : > { %v1597_v25 = vsub.f32 %v562_v43, %v480_v24  ;;  %v1640_v20 = vadd.s32 112, %v1619_v9  ;;  %v1643_v21 = vadd.s32 120, %v1619_v9  ;;  %v1648_v24 = vadd.s32 8, %v1619_v9 }
 0x102   : > { %v630_v26 = vsel %vm615_vm1, %v1595_v23, inf }
 0x103   : > { %v631_v27 = vmin.f32 %v623_v7, %v630_v26  ;;  %v628_v28 = vsel %vm615_vm1, %v1597_v25, inf  ;;  %v1238_v29 = vpop.f32.mrb[10].mxu0  ;;  %v1651_v26 = vadd.s32 32, %v1619_v9 }
 0x104   : > { %v629_v30 = vmin.f32 %v621_v11, %v628_v28  ;;  %v1603_v31 = vsub.f32 %v577_v17, %v1238_v29  ;;  %v490_v32 = vpop.f32.mrb[11].mxu0  ;;  %v1631_v17 = vadd.s32 56, %v1619_v9  ;;  %v1657_v28 = vadd.s32 64, %v1619_v9 }
 0x105   : > { %v609_v34 = vsub.f32 %v572_v44, %v490_v32  ;;  %v1660_v29 = vadd.s32 72, %v1619_v9  ;;  %v1666_v32 = vadd.s32 104, %v1619_v9 }
 0x106   : > { %v634_v35 = vsel %vm615_vm1, %v1603_v31, inf }
 0x107   : > { %v635_v36 = vmin.f32 %v627_v19, %v634_v35  ;;  %v632_v37 = vsel %vm615_vm1, %v609_v34, inf  ;;  %v1241_v38 = vpop.f32.mrb[12].mxu0  ;;  %v1637_v19 = vadd.s32 88, %v1619_v9 }
 0x108   : > { %v633_v39 = vmin.f32 %v625_v22, %v632_v37  ;;  %v1608_v40 = vsub.f32 %v587_v33, %v1241_v38  ;;  %v500_v41 = vpop.f32.mrb[13].mxu0 }
 0x109   : > { %v1610_v42 = vsub.f32 %v582_v45, %v500_v41 }
 0x10a   : > { %v638_v43 = vsel %vm615_vm1, %v1608_v40, inf }
 0x10b   : > { %v639_v48 = vmin.f32 %v631_v27, %v638_v43  ;;  %v636_v44 = vsel %vm615_vm1, %v1610_v42, inf  ;;  %v1244_v49 = vpop.f32.mrb[14].mxu0  ;;  %v1654_v27 = vadd.s32 40, %v1619_v9 }
 0x10c   : > { %v637_v50 = vmin.f32 %v629_v30, %v636_v44  ;;  %v614_v51 = vsub.f32 %v597_v47, %v1244_v49  ;;  %v510_v52 = vpop.f32.mrb[15].mxu0  ;;  %v1663_v30 = vadd.s32 96, %v1619_v9 }
 0x10d   : > { %v613_v53 = vsub.f32 %v1561_v46, %v510_v52 }
 0x10e   : > { %v644_v54 = vmin.f32 %v637_v50, %v639_v48  ;;  %v642_v55 = vsel %vm615_vm1, %v614_v51, inf }
 0x10f   : > { %v643_v58 = vmin.f32 %v635_v36, %v642_v55  ;;  %v640_v45 = vsel %vm615_vm1, %v613_v53, inf }
 0x110   : > { %v641_v60 = vmin.f32 %v633_v39, %v640_v45 }
 0x112   : > { %v645_v61 = vmin.f32 %v641_v60, %v643_v58 }
 0x114   : > { %v646_v63 = vmin.f32 %v644_v54, %v645_v61 }
 0x116   : > { %v647_v2 = vrot.slane %v646_v63, 4 }
 0x118   : > { %v648_v7 = vmin.f32 %v646_v63, %v647_v2 }
 0x11a   : > { %v649_v10 = vrot.slane %v648_v7, 2 }
 0x11c   : > { %v650_v11 = vmin.f32 %v648_v7, %v649_v10 }
 0x11e   : > { %v651_v46 = vrot.slane %v650_v11, 1 }
 0x120   : > { %v1645_v22 = vmin.f32 %v650_v11, %v651_v46 }
 0x122   : > { %vm672_vm2 = vcmp.le.f32.partialorder %v1579_v3, %v1645_v22  ;;  %vm673_vm3 = vcmp.le.f32.partialorder %v1573_v0, %v1645_v22  ;;  %vm676_vm4 = vcmp.le.f32.partialorder %v1585_v14, %v1645_v22  ;;  %vm677_vm5 = vcmp.le.f32.partialorder %v1583_v12, %v1645_v22 }
 0x123   : > { %vm680_vm6 = vcmp.le.f32.partialorder %v609_v34, %v1645_v22  ;;  %vm681_vm7 = vcmp.le.f32.partialorder %v1603_v31, %v1645_v22  ;;  %vm684_vm8 = vcmp.le.f32.partialorder %v613_v53, %v1645_v22  ;;  %vm685_vm9 = vcmp.le.f32.partialorder %v614_v51, %v1645_v22 }
 0x124   : > { %v688_v3 = vsel %vm672_vm2, %v1622_v13, 128  ;;  %v689_v33 = vsel %vm673_vm3, %v1625_v15, 128  ;;  %v692_v0 = vsel %vm676_vm4, %v1628_v16, 128  ;;  %v693_v14 = vsel %vm677_vm5, %v1631_v17, 128 }
 0x125   : > { %v696_v35 = vsel %vm680_vm6, %v1634_v18, 128  ;;  %v697_v12 = vsel %vm681_vm7, %v1637_v19, 128  ;;  %v700_v34 = vsel %vm684_vm8, %v1640_v20, 128  ;;  %v701_v31 = vsel %vm685_vm9, %v1643_v21, 128 }
 0x126   : > { %v704_v36 = vsel %vm615_vm1, %v688_v3, 2147483647  ;;  %v705_v37 = vsel %vm615_vm1, %v689_v33, 2147483647  ;;  %v712_v38 = vsel %vm615_vm1, %v692_v0, 2147483647  ;;  %vm670_vm10 = vcmp.le.f32.partialorder %v1565_v57, %v1645_v22 }
 0x127   : > { %vm713_vm11 = vcmp.lt.s32.totalorder %v704_v36, %v712_v38  ;;  %v715_v39 = vsel %vm615_vm1, %v693_v14, 2147483647  ;;  %v724_v41 = vsel %vm615_vm1, %v696_v35, 2147483647  ;;  %v727_v43 = vsel %vm615_vm1, %v697_v12, 2147483647 }
 0x128   : > { %v714_v47 = vsel %vm713_vm11, %v704_v36, %v712_v38  ;;  %vm716_vm12 = vcmp.lt.s32.totalorder %v705_v37, %v715_v39  ;;  %v736_v48 = vsel %vm615_vm1, %v700_v34, 2147483647  ;;  %v739_v44 = vsel %vm615_vm1, %v701_v31, 2147483647 }
 0x129   : > { %v717_v49 = vsel %vm716_vm12, %v705_v37, %v715_v39  ;;  %vm725_vm13 = vcmp.lt.s32.totalorder %v714_v47, %v724_v41  ;;  %vm671_vm14 = vcmp.le.f32.partialorder %v1563_v56, %v1645_v22  ;;  %vm674_vm15 = vcmp.le.f32.partialorder %v1569_v62, %v1645_v22 }
 0x12a   : > { %v726_v50 = vsel %vm725_vm13, %v714_v47, %v724_v41  ;;  %vm728_vm0 = vcmp.lt.s32.totalorder %v717_v49, %v727_v43  ;;  %vm675_vm2 = vcmp.le.f32.partialorder %v1567_v59, %v1645_v22  ;;  %vm678_vm3 = vcmp.le.f32.partialorder %v1597_v25, %v1645_v22 }
 0x12b   : > { %v729_v51 = vsel %vm728_vm0, %v717_v49, %v727_v43  ;;  %vm737_vm4 = vcmp.lt.s32.totalorder %v726_v50, %v736_v48  ;;  %vm679_vm5 = vcmp.le.f32.partialorder %v1595_v23, %v1645_v22  ;;  %vm682_vm6 = vcmp.le.f32.partialorder %v1610_v42, %v1645_v22 }
 0x12c   : > { %v738_v56 = vsel %vm737_vm4, %v726_v50, %v736_v48  ;;  %vm740_vm7 = vcmp.lt.s32.totalorder %v729_v51, %v739_v44  ;;  %vm683_vm8 = vcmp.le.f32.partialorder %v1608_v40, %v1645_v22  ;;  %v686_v59 = vsel %vm670_vm10, %v1619_v9, 128 }
 0x12d   : > { %v741_v62 = vsel %vm740_vm7, %v729_v51, %v739_v44  ;;  %v687_v25 = vsel %vm671_vm14, %v1648_v24, 128  ;;  %v690_v52 = vsel %vm674_vm15, %v1651_v26, 128  ;;  %v691_v23 = vsel %vm675_vm2, %v1654_v27, 128 }
 0x12e   : > { %vm744_vm9 = vcmp.lt.s32.totalorder %v738_v56, %v741_v62  ;;  %v694_v53 = vsel %vm678_vm3, %v1657_v28, 128  ;;  %v695_v55 = vsel %vm679_vm5, %v1660_v29, 128  ;;  %v702_v40 = vsel %vm615_vm1, %v686_v59, 2147483647 }
 0x12f   : > { %v745_v54 = vsel %vm744_vm9, %v738_v56, %v741_v62  ;;  %v703_v58 = vsel %vm615_vm1, %v687_v25, 2147483647  ;;  %v706_v57 = vsel %vm615_vm1, %v690_v52, 2147483647  ;;  %v709_v45 = vsel %vm615_vm1, %v691_v23, 2147483647 }
 0x130   : > { %v698_v60 = vsel %vm682_vm6, %v1663_v30, 128  ;;  %v699_v61 = vsel %vm683_vm8, %v1666_v32, 128  ;;  %vm707_vm10 = vcmp.lt.s32.totalorder %v702_v40, %v706_v57  ;;  %vm710_vm11 = vcmp.lt.s32.totalorder %v703_v58, %v709_v45 }
 0x131   : > { %v708_v63 = vsel %vm707_vm10, %v702_v40, %v706_v57  ;;  %v711_v1 = vsel %vm710_vm11, %v703_v58, %v709_v45  ;;  %v718_v2 = vsel %vm615_vm1, %v694_v53, 2147483647  ;;  %v721_v7 = vsel %vm615_vm1, %v695_v55, 2147483647 }
 0x132   : > { %vm719_vm12 = vcmp.lt.s32.totalorder %v708_v63, %v718_v2  ;;  %vm722_vm13 = vcmp.lt.s32.totalorder %v711_v1, %v721_v7  ;;  %v730_v46 = vsel %vm615_vm1, %v698_v60, 2147483647  ;;  %v733_v3 = vsel %vm615_vm1, %v699_v61, 2147483647 }
 0x133   : > { %v720_v10 = vsel %vm719_vm12, %v708_v63, %v718_v2  ;;  %v723_v11 = vsel %vm722_vm13, %v711_v1, %v721_v7  ;;  %vm757_vm5 = vcmask 516096   ;;  %v1376_v37 = vmov 1.0|1.0  }
 0x134   : > { %vm731_vm14 = vcmp.lt.s32.totalorder %v720_v10, %v730_v46  ;;  %vm734_vm15 = vcmp.lt.s32.totalorder %v723_v11, %v733_v3 }
 0x135   : > { %v732_v42 = vsel %vm731_vm14, %v720_v10, %v730_v46  ;;  %v735_v22 = vsel %vm734_vm15, %v723_v11, %v733_v3 }
 0x136   : > { %vm742_vm0 = vcmp.lt.s32.totalorder %v732_v42, %v735_v22 }
 0x137   : > { %v743_v33 = vsel %vm742_vm0, %v732_v42, %v735_v22 }
 0x138   : > { %vm746_vm2 = vcmp.lt.s32.totalorder %v743_v33, %v745_v54 }
 0x139   : > { %v747_v0 = vsel %vm746_vm2, %v743_v33, %v745_v54 }
 0x13a   : > { %v748_v14 = vrot.slane %v747_v0, 4 }
 0x13c   : > { %vm749_vm3 = vcmp.lt.s32.totalorder %v747_v0, %v748_v14 }
 0x13d   : > { %v750_v35 = vsel %vm749_vm3, %v747_v0, %v748_v14 }
 0x13e   : > { %v751_v12 = vrot.slane %v750_v35, 2 }
 0x140   : > { %vm752_vm4 = vcmp.lt.s32.totalorder %v750_v35, %v751_v12 }
 0x141   : > { %v753_v34 = vsel %vm752_vm4, %v750_v35, %v751_v12 }
 0x142   : > { %v754_v31 = vrot.slane %v753_v34, 1 }
 0x144   : > { %vm755_vm6 = vcmp.lt.s32.totalorder %v753_v34, %v754_v31 }
 0x145   : > { %v756_v36 = vsel %vm755_vm6, %v753_v34, %v754_v31 }
 0x146   : > { %758 = vst.msk [vmem:[%s282_s7] sm:$0x1] %vm757_vm5, %v756_v36  ;;  %vm759_vm7 = vcmp.eq.s32.totalorder %v1619_v9, %v756_v36  ;;  %vm760_vm8 = vcmp.eq.s32.totalorder %v1648_v24, %v756_v36  ;;  %vm761_vm9 = vcmp.eq.s32.totalorder %v1622_v13, %v756_v36  ;;  %vm762_vm10 = vcmp.eq.s32.totalorder %v1625_v15, %v756_v36  ;;  %v824_v9 = vpop.trf.xlu0 }
 0x147   : > { %vm1291_vm11 = vmpackc.low %vm760_vm8, %vm759_vm7  ;;  %vm763_vm13 = vcmp.eq.s32.totalorder %v1651_v26, %v756_v36  ;;  %vm764_vm14 = vcmp.eq.s32.totalorder %v1654_v27, %v756_v36  ;;  %vm765_vm0 = vcmp.eq.s32.totalorder %v1628_v16, %v756_v36  ;;  %vm766_vm2 = vcmp.eq.s32.totalorder %v1631_v17, %v756_v36 }
 0x148   : > { %1292 = vmatprep.subr.msk.bf16.mxu1 %vm1291_vm11, %v1376_v37  ;;  %vm1295_vm12 = vmpackc.low %vm762_vm10, %vm761_vm9  ;;  %vm767_vm4 = vcmp.eq.s32.totalorder %v1657_v28, %v756_v36  ;;  %vm768_vm5 = vcmp.eq.s32.totalorder %v1660_v29, %v756_v36  ;;  %vm769_vm7 = vcmp.eq.s32.totalorder %v1634_v18, %v756_v36  ;;  %vm770_vm8 = vcmp.eq.s32.totalorder %v1637_v19, %v756_v36 }
 0x149   : > { %1294 = vmatpush3.bf16.msk.msra.mxu1 %vm1291_vm11, %v1376_v37  ;;  %vm1299_vm15 = vmpackc.low %vm764_vm14, %vm763_vm13  ;;  %vm771_vm10 = vcmp.eq.s32.totalorder %v1663_v30, %v756_v36  ;;  %vm772_vm11 = vcmp.eq.s32.totalorder %v1666_v32, %v756_v36  ;;  %vm773_vm13 = vcmp.eq.s32.totalorder %v1640_v20, %v756_v36  ;;  %vm774_vm14 = vcmp.eq.s32.totalorder %v1643_v21, %v756_v36 }
 0x14a   : > { %1296 = vmatprep.subr.msk.bf16.mxu1 %vm1295_vm12, %v1376_v37  ;;  %vm1303_vm3 = vmpackc.low %vm766_vm2, %vm765_vm0  ;;  %v825_v13 = vpop.trf.xlu0  ;;  %vm957_vm0 = vcmask 0  }
 0x14b   : > { %vm1307_vm6 = vmpackc.low %vm768_vm5, %vm767_vm4 }
 0x14c   : > { %vm1311_vm9 = vmpackc.low %vm770_vm8, %vm769_vm7 }
 0x14d   : > { %1298 = vmatpush3.bf16.msk.msra.mxu1 %vm1295_vm12, %v1376_v37  ;;  %vm1315_vm12 = vmpackc.low %vm772_vm11, %vm771_vm10 }
 0x14e   : > { %1300 = vmatprep.subr.msk.bf16.mxu1 %vm1299_vm15, %v1376_v37  ;;  %v826_v15 = vpop.trf.xlu0 }
 0x151   : > { %1302 = vmatpush3.bf16.msk.msra.mxu1 %vm1299_vm15, %v1376_v37  ;;  %vm1319_vm15 = vmpackc.low %vm774_vm14, %vm773_vm13 }
 0x152   : > { %1304 = vmatprep.subr.msk.bf16.mxu1 %vm1303_vm3, %v1376_v37 }
 0x155   : > { %1306 = vmatpush3.bf16.msk.msra.mxu1 %vm1303_vm3, %v1376_v37 }
 0x156   : > { %1308 = vmatprep.subr.msk.bf16.mxu1 %vm1307_vm6, %v1376_v37 }
 0x159   : > { %1310 = vmatpush3.bf16.msk.msra.mxu1 %vm1307_vm6, %v1376_v37 }
 0x15a   : > { %1312 = vmatprep.subr.msk.bf16.mxu1 %vm1311_vm9, %v1376_v37 }
 0x15d   : > { %1314 = vmatpush3.bf16.msk.msra.mxu1 %vm1311_vm9, %v1376_v37 }
 0x15e   : > { %1316 = vmatprep.subr.msk.bf16.mxu1 %vm1315_vm12, %v1376_v37 }
 0x161   : > { %1318 = vmatpush3.bf16.msk.msra.mxu1 %vm1315_vm12, %v1376_v37 }
 0x162   : > { %1320 = vmatprep.subr.msk.bf16.mxu1 %vm1319_vm15, %v1376_v37 }
 0x165   : > { %1322 = vmatpush3.bf16.msk.msra.mxu1 %vm1319_vm15, %v1376_v37 }
 0x168   : > { %1278 = vmatmul.mubr.f32.vlgmr.msra.gmra.mrb[0].mxu1 %v824_v9 }
 0x169   : > { %1280 = vmatprep.mubr.f32.mxu1 %v825_v13 }
 0x16c   : > { %1281 = vmatmul.mubr.f32.gmra.mrb[2].mxu1 %v826_v15 }
 0x23b   : > { %v1279_v16 = vpop.f32.mrb[0].mxu1 }
 0x23c   : > { %925 = vst.msk [vmem:[%s276_s10 + $0x8] sm:$0xff] %vm615_vm1, %v1279_v16  ;;  %v929_v17 = vsub.f32 %v1279_v16, %v1448_v5  ;;  %v905_v18 = vpop.f32.mrb[1].mxu1 }
 0x23d   : > { %924 = vst.msk [vmem:[%s276_s10] sm:$0xff] %vm615_vm1, %v905_v18  ;;  %v928_v19 = vsub.f32 %v905_v18, %v1446_v4 }
 0x23e   : > { %v933_v20 = vmul.f32 %v929_v17, %v929_v17 }
 0x23f   : > { %v1282_v21 = vpop.f32.mrb[2].mxu1  ;;  %v932_v24 = vmul.f32 %v928_v19, %v928_v19 }
 0x240   : > { %v939_v26 = vsel %vm615_vm1, %v933_v20, 0.0  ;;  %927 = vst.msk [vmem:[%s276_s10 + $0x18] sm:$0xff] %vm615_vm1, %v1282_v21  ;;  %v915_v27 = vpop.f32.mrb[3].mxu1  ;;  %v931_v5 = vsub.f32 %v1282_v21, %v1454_v8 }
 0x241   : > { %940 = vadd.xlane.f32.xlu1 %v939_v26  ;;  %926 = vst.msk [vmem:[%s276_s10 + $0x10] sm:$0xff] %vm615_vm1, %v915_v27  ;;  %v930_v28 = vsub.f32 %v915_v27, %v1450_v6  ;;  %v936_v30 = vsel %vm615_vm1, %v932_v24, 0.0 }
 0x242   : > { %v935_v32 = vmul.f32 %v931_v5, %v931_v5 }
 0x243   : > { %v934_v29 = vmul.f32 %v930_v28, %v930_v28 }
 0x244   : > { %v945_v38 = vsel %vm615_vm1, %v935_v32, 0.0 }
 0x245   : > { %937 = vadd.xlane.f32.xlu1 %v936_v30  ;;  %v942_v4 = vsel %vm615_vm1, %v934_v29, 0.0 }
 0x249   : > { %943 = vadd.xlane.f32.xlu1 %v942_v4 }
 0x24d   : > { %946 = vadd.xlane.f32.xlu1 %v945_v38 }
 0x2ce   : > { %v941_v39 = vpop.xlane.xlu1 %940 }
 0x2d2   : > { %v938_v41 = vpop.xlane.xlu1 %937 }
 0x2d3   : > { %v948_v47 = vadd.f32 %v941_v39, %v938_v41 }
 0x2d6   : > { %v944_v43 = vpop.xlane.xlu1 %943 }
 0x2d7   : > { %v949_v48 = vadd.f32 %v948_v47, %v944_v43 }
 0x2da   : > { %v947_v6 = vpop.xlane.xlu1 %946 }
 0x2db   : > { %v950_v44 = vadd.f32 %v949_v48, %v947_v6 }
 0x2dd   : > { %v951_v49 = vrot.slane %v950_v44, 4 }
 0x2df   : > { %v952_v8 = vadd.f32 %v951_v49, %v950_v44 }
 0x2e1   : > { %v953_v50 = vrot.slane %v952_v8, 2 }
 0x2e3   : > { %v954_v51 = vadd.f32 %v953_v50, %v952_v8 }
 0x2e5   : > { %v955_v56 = vrot.slane %v954_v51, 1 }
 0x2e7   : > { %v956_v59 = vadd.f32 %v955_v56, %v954_v51 }
 0x2e9   : > { %958 = vst.msk [vmem:[%s288_s12] sm:$0x1] %vm957_vm0, %v956_v59 }
 0x2ea PF: > { %s16_s20 = sadd.s32 1, %s1373_s20   ;;  %s1791_s18 = smov %s1369_s19 }
 0x2eb   : > { %p13_p5 = scmp.ge.s32.totalorder %s16_s20, 4   ;;  %s1792_s19 = smov %s1794_s21 }
 0x2ed   :  { %15 = sbr.rel (!%p13_p5) target bundleno = 2 (0x2), region = 86 }

</bundles_post_ra>
